<compile_context>
chip_gen: v5e
topology: v5e:2x2
jax: 0.10.0
libtpu: 0.0.40
codegen_flags: <defaults>
</compile_context>

<pallas_src>
import jax
import jax.numpy as jnp
from jax.experimental import pallas as pl
from jax.experimental.pallas import tpu as pltpu


def _motion_prompt_kernel(params_ref, x_ref, attn_ref):
    # params_ref: SMEM (2,) float32  -> [a / C, b]
    # x_ref:      VMEM (1, T, C, TH, W)
    # attn_ref:   VMEM (1, T-1, TH, W)
    a_over_c = params_ref[0]
    b = params_ref[1]

    x = x_ref[...]                                    # (1, T, C, TH, W)
    s = jnp.sum(x, axis=2)                            # (1, T, TH, W)  channel sum
    diff = s[:, 1:, :, :] - s[:, :-1, :, :]           # (1, T-1, TH, W)
    attn_ref[...] = jax.nn.sigmoid(a_over_c * jnp.abs(diff) + b)


def _choose_h_tile(T, C, H, W, target_bytes=2 << 20):
    """Largest H-tile (multiple of 8, divides H) with input block <= ~target."""
    if H % 8 != 0:
        return H                       # full-extent block is always legal
    bytes_per_row = T * C * W * 4
    th = max(8, min(H, (max(1, target_bytes // bytes_per_row) // 8) * 8))
    while H % th != 0:                 # terminates at 8 since H % 8 == 0
        th -= 8
    return th


def motion_prompt(x, a, b):
    """x: [B, T, C, H, W] float32. a, b: scalar params. Returns (feat, attn, None)."""
    B, T, C, H, W = x.shape
    # Fold the 1/C of the channel mean into `a` once (host-side).
    params = jnp.stack([a / jnp.float32(C), b]).astype(jnp.float32)  # (2,)

    TH = _choose_h_tile(T, C, H, W)
    n_h = H // TH

    # Explicit scoped-VMEM budget: double-buffered input + attn blocks, plus
    # headroom; conservative floor so tiny test shapes still compile cleanly.
    in_block_bytes = T * C * TH * W * 4
    attn_block_bytes = (T - 1) * TH * W * 4
    vmem_limit = min(
        48 << 20,
        max(16 << 20, 2 * (in_block_bytes + attn_block_bytes) * 2 + (2 << 20)),
    )

    attn = pl.pallas_call(
        _motion_prompt_kernel,
        out_shape=jax.ShapeDtypeStruct((B, T - 1, H, W), jnp.float32),
        grid_spec=pltpu.PrefetchScalarGridSpec(
            num_scalar_prefetch=0,
            grid=(B, n_h),
            in_specs=[
                pl.BlockSpec(memory_space=pltpu.MemorySpace.SMEM),         # params
                pl.BlockSpec((1, T, C, TH, W), lambda b, h: (b, 0, 0, h, 0)),
            ],
            out_specs=pl.BlockSpec((1, T - 1, TH, W), lambda b, h: (b, 0, h, 0)),
        ),
        compiler_params=pltpu.CompilerParams(
            dimension_semantics=("parallel", "parallel"),
            vmem_limit_bytes=int(vmem_limit),
        ),
    )(params, x)

    # motion_features is 3 identical copies of attn; produce it lazily here so
    # a jitted consumer (attn * frames) never materializes it in HBM.
    feat = jnp.broadcast_to(attn[:, :, None, :, :], (B, T - 1, C, H, W))
    return feat, attn, None


def _reference(x, a, b):
    gray = jnp.mean(x, axis=2)
    diff = gray[:, 1:] - gray[:, :-1]
    attn = jax.nn.sigmoid(a * jnp.abs(diff) + b)
    feat = jnp.broadcast_to(
        attn[:, :, None, :, :],
        (x.shape[0], x.shape[1] - 1, x.shape[2], x.shape[3], x.shape[4]),
    )
    return feat, attn


if __name__ == "__main__":
    key = jax.random.PRNGKey(0)
    kx, ka, kb = jax.random.split(key, 3)

    # Small shapes consistent with the module: B=2, T=3 frames, C=3 channels.
    B, T, C, H, W = 2, 3, 3, 16, 128
    x = jax.random.normal(kx, (B, T, C, H, W), dtype=jnp.float32)

    # nn.Parameter(torch.randn(1)) equivalents, deterministic in-script.
    a = jax.random.normal(ka, (), dtype=jnp.float32)
    b = jax.random.normal(kb, (), dtype=jnp.float32)

    feat, attn, none_out = motion_prompt(x, a, b)
    feat = jax.block_until_ready(feat)
    attn = jax.block_until_ready(attn)

    ref_feat, ref_attn = _reference(x, a, b)
    assert feat.shape == (B, T - 1, C, H, W)
    assert attn.shape == (B, T - 1, H, W)
    assert none_out is None
    assert jnp.allclose(attn, ref_attn, atol=1e-5, rtol=1e-5)
    assert jnp.allclose(feat, ref_feat, atol=1e-5, rtol=1e-5)

    print("KERNEL_OK")
</pallas_src>

<mosaic_0001>
module attributes {stable_mosaic.version = 11 : i64} {
  func.func @_motion_prompt_kernel(%arg0: i32, %arg1: i32, %arg2: memref<2xf32, #tpu.memory_space<smem>>, %arg3: memref<1x3x3x16x128xf32, #tpu.memory_space<vmem>>, %arg4: memref<1x2x16x128xf32, #tpu.memory_space<vmem>>) attributes {dimension_semantics = [#tpu.dimension_semantics<parallel>, #tpu.dimension_semantics<parallel>], iteration_bounds = array<i64: 2, 1>, scalar_prefetch = 0 : i64, scratch_operands = 0 : i64, tpu.core_type = #tpu.core_type<tc>, window_params = [{transform_indices = @transform_0, window_bounds = array<i64: 2>}, {transform_indices = @transform_1, window_bounds = array<i64: 1, 3, 3, 16, 128>}, {transform_indices = @transform_2, window_bounds = array<i64: 1, 2, 16, 128>}]} {
    %c0 = arith.constant 0 : index
    %0 = memref.load %arg2[%c0] : memref<2xf32, #tpu.memory_space<smem>>
    %c1 = arith.constant 1 : index
    %1 = memref.load %arg2[%c1] : memref<2xf32, #tpu.memory_space<smem>>
    %c0_0 = arith.constant 0 : index
    %c0_1 = arith.constant 0 : index
    %c0_2 = arith.constant 0 : index
    %c0_3 = arith.constant 0 : index
    %c0_4 = arith.constant 0 : index
    %2 = vector.load %arg3[%c0_0, %c0_1, %c0_2, %c0_3, %c0_4] : memref<1x3x3x16x128xf32, #tpu.memory_space<vmem>>, vector<1x3x3x16x128xf32>
    %cst = arith.constant dense<0.000000e+00> : vector<1x3x16x128xf32>
    %3 = vector.multi_reduction <add>, %2, %cst [2] : vector<1x3x3x16x128xf32> to vector<1x3x16x128xf32>
    %4 = vector.extract_strided_slice %3 {offsets = [0, 1, 0, 0], sizes = [1, 2, 16, 128], strides = [1, 1, 1, 1]} : vector<1x3x16x128xf32> to vector<1x2x16x128xf32>
    %5 = vector.extract_strided_slice %3 {offsets = [0, 0, 0, 0], sizes = [1, 2, 16, 128], strides = [1, 1, 1, 1]} : vector<1x3x16x128xf32> to vector<1x2x16x128xf32>
    %6 = arith.subf %4, %5 : vector<1x2x16x128xf32>
    %7 = math.absf %6 : vector<1x2x16x128xf32>
    %8 = vector.broadcast %0 : f32 to vector<1x2x16x128xf32>
    %9 = arith.mulf %8, %7 : vector<1x2x16x128xf32>
    %10 = vector.broadcast %1 : f32 to vector<1x2x16x128xf32>
    %11 = arith.addf %9, %10 : vector<1x2x16x128xf32>
    %12 = arith.negf %11 : vector<1x2x16x128xf32>
    %13 = math.exp %12 : vector<1x2x16x128xf32>
    %cst_5 = arith.constant 1.000000e+00 : f32
    %14 = vector.broadcast %cst_5 : f32 to vector<1x2x16x128xf32>
    %15 = arith.addf %14, %13 : vector<1x2x16x128xf32>
    %16 = arith.divf %14, %15 : vector<1x2x16x128xf32>
    %c0_6 = arith.constant 0 : index
    %c0_7 = arith.constant 0 : index
    %c0_8 = arith.constant 0 : index
    %c0_9 = arith.constant 0 : index
    %17 = vector.load %arg4[%c0_6, %c0_7, %c0_8, %c0_9] : memref<1x2x16x128xf32, #tpu.memory_space<vmem>>, vector<1x2x16x128xf32>
    tpu.vector_store %arg4[%c0_6, %c0_7, %c0_8, %c0_9], %16 {strides = array<i32>} : memref<1x2x16x128xf32, #tpu.memory_space<vmem>>, vector<1x2x16x128xf32>,
    return
  }
  func.func @transform_0(%arg0: i32, %arg1: i32) -> i32 {
    %c0_i32 = arith.constant 0 : i32
    %c0_i32_0 = arith.constant 0 : i32
    return %c0_i32 : i32
  }
  func.func @transform_1(%arg0: i32, %arg1: i32) -> (i32, i32, i32, i32, i32) {
    %c0_i32 = arith.constant 0 : i32
    %c0_i32_0 = arith.constant 0 : i32
    %c0_i32_1 = arith.constant 0 : i32
    %c0_i32_2 = arith.constant 0 : i32
    return %arg0, %c0_i32, %c0_i32_0, %arg1, %c0_i32_1 : i32, i32, i32, i32, i32
  }
  func.func @transform_2(%arg0: i32, %arg1: i32) -> (i32, i32, i32, i32) {
    %c0_i32 = arith.constant 0 : i32
    %c0_i32_0 = arith.constant 0 : i32
    %c0_i32_1 = arith.constant 0 : i32
    return %arg0, %c0_i32, %arg1, %c0_i32_0 : i32, i32, i32, i32
  }
}

</mosaic_0001>

<bundles_post_ra>
// kernel: tpu_custom_call.1
= control target key start
LH: loop header
LB: loop body
LE: loop exit
PB: predicated region body
PF: predicated region fallthrough
CT: control target
= control target key end

     0   :  { %7 = vsyncpa [#allocation5], 0  ;;  %s934_s0 = inlined_call_operand.hbm [shape: f32[2], index: 0, kind: input, shape index: {}]   ;;  %s935_s1 = inlined_call_operand.hbm [shape: f32[2,3,3,16,128], index: 1, kind: input, shape index: {}]   ;;  %s936_s2 = inlined_call_operand.hbm [shape: f32[2,2,16,128], index: 2, kind: output, shape index: {}]  }
   0x1   :  { %8 = vsyncpa [#allocation3], 0 }
   0x2   :  { %10 = vsyncpa [#allocation3 + $0x1], 0 }
   0x3   :  { %11 = vsyncpa [#allocation4], 0 }
   0x4   :  { %13 = vsyncpa [#allocation4 + $0x1], 0  ;;  %s714_s9 = smov 0   ;;  %s716_s10 = smov 0  }
   0x5   :  { %s718_s11 = smov 0   ;;  %s720_s12 = smov 0  }
   0x6   :  { %s722_s13 = smov 0   ;;  %s724_s14 = smov 0  }
   0x7 LB: > { %s445_s15 = sadd.s32 4294967295, %s692_s14   ;;  %s446_s16 = sadd.s32 4294967294, %s692_s14   ;;  %s692_s14 = sphi %s724_s14, %s19_s14   ;;  %s688_s13 = sphi %s722_s13, %s958_s13   ;;  %s684_s12 = sphi %s720_s12, %s957_s12   ;;  %s680_s11 = sphi %s718_s11, %s956_s11   ;;  %s676_s10 = sphi %s716_s10, %s955_s10   ;;  %s672_s9 = sphi %s714_s9, %s954_s9  }
   0x8   : > { %s61_s17 = sadd.s32 1, %s680_s11  ;;  %p68_p0 = scmp.ne.s32.totalorder %s680_s11, %s676_s10 }
   0x9   : > { %p69_p1 = scmp.eq.s32.totalorder %s692_s14, 0  ;;  %p74_p2 = scmp.ne.s32.totalorder %s676_s10, %s672_s9 }
   0xa   : > { %p752_p3 = scmp.eq.s32.totalorder %s445_s15, 0  ;;  %p100_p4 = scmp.eq.s32.totalorder %s445_s15, 1 }
   0xb   : > { %p756_p5 = por %p69_p1, %p68_p0  ;;  %p106_p6 = scmp.eq.s32.totalorder %s446_s16, 1 }
   0xc   : > { %p762_p7 = por %p752_p3, %p74_p2  ;;  %p766_p8 = por %p100_p4, %p68_p0 }
   0xd   : > { %p770_p9 = por %p106_p6, %p74_p2  ;;  %p447_p10 = scmp.ge.s32.totalorder %s692_s14, 1 }
   0xe   : > { %p113_p11 = scmp.lt.s32.totalorder %s692_s14, 3  ;;  %s125_s25 = sshll.u32 %s934_s0, 4  ;;  %s126_s25 = int_to_ptr.hbm [resolvable:$true] %s125_s25 }
   0xf   : > { %p449_p13 = scmp.ge.s32.totalorder %s692_s14, 2  ;;  %p489_p0 = scmp.lt.s32.totalorder %s692_s14, 2 }
  0x10   : > { %p779_p12 = pnand %p447_p10, %p113_p11  ;;  %s31_s28 = sadd.s32 1, %s688_s13 }
  0x11   : > { %p789_p2 = pnand %p489_p0, %p756_p5  ;;  %p33_p6 = scmp.ge.s32.totalorder %s31_s28, 2 }
  0x12   : > { %p476_p1 = pneg %p779_p12  ;;  %s136_s29 = sand.u32 1, %s680_s11  }
  0x13   : > { %s694_s30 = smov [#allocation2]   ;;  %s960_s28 = smov (%p33_p6, %s31_s28), 0 }
  0x14   : > { %p477_p4 = pnand %p476_p1, %p752_p3  ;;  %s465_s3 = smul.u32 144, %s136_s29 }
  0x15   : > { %s56_s4 = ssub.s32 %s688_s13, %s960_s28  ;;  %s466_s5 = smul.u32 144, %s688_s13 }
  0x16   : > { %479 = dma.hbm_to_smem (!%p477_p4), %s126_s25, 16, %s694_s30, [#allocation5]  }
  0x17   : > { %p59_p10 = scmp.eq.s32.totalorder %s56_s4, 0  ;;  %s147_s8 = scalar_lea.hbm %s935_s1, %s466_s5 }
  0x18   : > { %s140_s15 = scalar_lea.vmem [#allocation6], %s465_s3  ;;  %s148_s23 = sshll.u32 %s147_s8, 4  ;;  %s149_s23 = int_to_ptr.hbm [resolvable:$true] %s148_s23 }
  0x19   : > { %s150_s16 = sshll.u32 %s140_s15, 4  ;;  %s137_s24 = scalar_lea.sflag [#allocation3], %s136_s29  ;;  %s151_s16 = int_to_ptr.vmem [resolvable:$true] %s150_s16 }
  0x1a   : > { %s808_s19 = scalar_select %p59_p10, %s680_s11, %s61_s17  }
  0x1b   : > { %s695_s25 = smov 128   ;;  %s696_s30 = smov 8  }
  0x1c   : > { %483 = dma.hbm_to_vmem [thread:$0]  (!%p789_p2), %s149_s23, 2304, %s151_s16, %s137_s24, %s695_s25, %s695_s25, %s696_s30  }
  0x1d   : > { %162 = sbr.rel (%p779_p12) target bundleno = 92 (0x5c), region = 28 }
  0x22   : > { %659 = dma.done.wait (%p752_p3), [#allocation5], 16  }
  0x23   : > { %661 = vsyncadd (%p752_p3), [#allocation5], 4294967280  ;;  %s819_s17 = sand.u32 1, %s676_s10  }
  0x24   : > { %s467_s29 = smul.u32 144, %s819_s17  ;;  %s170_s3 = scalar_lea.sflag [#allocation3], %s819_s17 }
  0x26   : > { %s823_s4 = scalar_lea.vmem [#allocation6], %s467_s29 }
  0x27   : > { %663 = dma.done.wait (%p762_p7), %s170_s3, 2304  }
  0x28   : > { %665 = vsyncadd (%p762_p7), %s170_s3, 4294964992 }
  0x29   : > { %179 = sfence }
  0x2a   : > { %s829_s26 = sld [smem:[#allocation2]]  ;;  %v200_v0 = vld [vmem:[%s823_s4] sm:$0xff]  ;;  %v202_v1 = vld [vmem:[%s823_s4 + $0x10] sm:$0xff]  ;;  %v201_v8 = vld [vmem:[%s823_s4 + $0x8] sm:$0xff]  ;;  %s453_s20 = sshll.u32 %s819_s17, 5 }
  0x2b   : > { %v204_v2 = vld [vmem:[%s823_s4 + $0x20] sm:$0xff]  ;;  %s834_s18 = sld [smem:[#allocation2 + $0x1]]  ;;  %v206_v3 = vld [vmem:[%s823_s4 + $0x30] sm:$0xff]  ;;  %v218_v6 = vadd.f32 %v202_v1, %v200_v0  ;;  %v203_v9 = vld [vmem:[%s823_s4 + $0x18] sm:$0xff]  ;;  %s464_s27 = sshll.u32 %s684_s12, 5 }
  0x2c   : > { %v208_v4 = vld [vmem:[%s823_s4 + $0x40] sm:$0xff]  ;;  %v210_v5 = vld [vmem:[%s823_s4 + $0x50] sm:$0xff]  ;;  %v205_v10 = vld [vmem:[%s823_s4 + $0x28] sm:$0xff]  ;;  %v220_v15 = vadd.f32 %v203_v9, %v201_v8  ;;  %s342_s6 = scalar_lea.hbm %s936_s2, %s464_s27  ;;  %s195_s7 = scalar_lea.vmem [#allocation7], %s453_s20 }
  0x2d   : > { %v222_v7 = vadd.f32 %v208_v4, %v206_v3  ;;  %v219_v11 = vadd.f32 %v218_v6, %v204_v2  ;;  %v207_v12 = vld [vmem:[%s823_s4 + $0x38] sm:$0xff]  ;;  %v209_v13 = vld [vmem:[%s823_s4 + $0x48] sm:$0xff]  ;;  %v212_v18 = vld [vmem:[%s823_s4 + $0x60] sm:$0xff]  ;;  %s343_s8 = sshll.u32 %s195_s7, 4  ;;  %s345_s15 = sshll.u32 %s342_s6, 4  ;;  %s893_s8 = int_to_ptr.vmem [resolvable:$true] %s343_s8  ;;  %s346_s15 = int_to_ptr.hbm [resolvable:$true] %s345_s15 }
  0x2e   : > { %v211_v14 = vld [vmem:[%s823_s4 + $0x58] sm:$0xff]  ;;  %v224_v17 = vadd.f32 %v209_v13, %v207_v12  ;;  %v214_v19 = vld [vmem:[%s823_s4 + $0x70] sm:$0xff]  ;;  %v216_v20 = vld [vmem:[%s823_s4 + $0x80] sm:$0xff]  ;;  %v221_v21 = vadd.f32 %v220_v15, %v205_v10  ;;  %s329_s16 = scalar_lea.sflag [#allocation4], %s819_s17  ;;  %s620_s23 = sshra.s32 %s346_s15, 4  ;;  %s621_s23 = int_to_ptr.hbm [resolvable:$true] %s620_s23 }
  0x2f   : > { %v223_v16 = vadd.f32 %v222_v7, %v210_v5  ;;  %v226_v22 = vadd.f32 %v214_v19, %v212_v18  ;;  %v213_v23 = vld [vmem:[%s823_s4 + $0x68] sm:$0xff]  ;;  %v215_v24 = vld [vmem:[%s823_s4 + $0x78] sm:$0xff]  ;;  %s622_s24 = scalar_lea.hbm %s621_s23, 32  ;;  %s626_s29 = scalar_lea.hbm %s936_s2, 64 }
  0x30   : > { %v217_v25 = vld [vmem:[%s823_s4 + $0x88] sm:$0xff]  ;;  %v225_v27 = vadd.f32 %v224_v17, %v211_v14  ;;  %v228_v28 = vadd.f32 %v215_v24, %v213_v23  ;;  %v238_v29 = vstv %s829_s26  ;;  %p623_p3 = scmp.ne.s32.totalorder %s621_s23, %s622_s24  ;;  %p627_p11 = scmp.lt.s32.totalorder %s621_s23, %s936_s2 }
  0x31   : > { %v230_v26 = vsub.f32 %v223_v16, %v219_v11  ;;  %v227_v30 = vadd.f32 %v226_v22, %v216_v20  ;;  %v243_v34 = vstv %s834_s18  ;;  %p628_p12 = scmp.lt.s32.totalorder %s626_s29, %s622_s24 }
  0x32   : > { %v231_v32 = vsub.f32 %v225_v27, %v221_v21  ;;  %v229_v33 = vadd.f32 %v228_v28, %v217_v25  ;;  %p624_p5 = pnand %p623_p3, %p766_p8 }
  0x33   : > { %v234_v31 = vand.u32 2147483647, %v230_v26  ;;  %v232_v35 = vsub.f32 %v227_v30, %v223_v16  ;;  %p629_p0 = por %p628_p12, %p627_p11 }
  0x34   : > { %v235_v37 = vand.u32 2147483647, %v231_v32  ;;  %v233_v38 = vsub.f32 %v229_v33, %v225_v27  ;;  %p625_p7 = pneg %p624_p5 }
  0x35   : > { %v239_v36 = vmul.f32 %v238_v29, %v234_v31  ;;  %v236_v39 = vand.u32 2147483647, %v232_v35 }
  0x36   : > { %v240_v41 = vmul.f32 %v238_v29, %v235_v37  ;;  %v237_v42 = vand.u32 2147483647, %v233_v38  ;;  %p630_p1 = pnand %p629_p0, %p625_p7 }
  0x37   : > { %v244_v40 = vadd.f32 %v243_v34, %v239_v36  ;;  %v241_v43 = vmul.f32 %v238_v29, %v236_v39 }
  0x38   : > { %v245_v45 = vadd.f32 %v243_v34, %v240_v41  ;;  %v242_v46 = vmul.f32 %v238_v29, %v237_v42 }
  0x39   : > { %v455_v44 = vmul.f32 -1.442695, %v244_v40  ;;  %v246_v47 = vadd.f32 %v243_v34, %v241_v43 }
  0x3a   : > { %v456_v48 = vmul.f32 -1.442695, %v245_v45  ;;  %v247_v49 = vadd.f32 %v243_v34, %v242_v46 }
  0x3b   : > { %545 = vpow2.f32 %v455_v44  ;;  %v457_v50 = vmul.f32 -1.442695, %v246_v47 }
  0x3c   : > { %547 = vpow2.f32 %v456_v48  ;;  %v458_v51 = vmul.f32 -1.442695, %v247_v49 }
  0x3d   : > { %549 = vpow2.f32 %v457_v50 }
  0x3e   : > { %551 = vpow2.f32 %v458_v51 }
  0x41   : > { %v546_v52 = vpop.eup %545 }
  0x42   : > { %v260_v53 = vadd.f32 1.0, %v546_v52  ;;  %v548_v54 = vpop.eup %547 }
  0x43   : > { %v550_v55 = vpop.eup %549  ;;  %v261_v57 = vadd.f32 1.0, %v548_v54 }
  0x44   : > { %553 = vrcp.f32 %v260_v53  ;;  %v552_v56 = vpop.eup %551  ;;  %v262_v58 = vadd.f32 1.0, %v550_v55  ;;  %v273_v60 = vand.u32 2147483647, %v260_v53  ;;  %v275_v61 = vand.u32 2147483648, %v260_v53 }
  0x45   : > { %v263_v59 = vadd.f32 1.0, %v552_v56  ;;  %555 = vrcp.f32 %v261_v57  ;;  %vm269_vm0 = vweird.f32 %v260_v53  ;;  %vm284_vm3 = vweird.f32 %v261_v57 }
  0x46   : > { %557 = vrcp.f32 %v262_v58  ;;  %vm853_vm1 = vcmp.eq.f32.partialorder %v273_v60, 8.507059e+37  ;;  %v276_v3 = vor.u32 1.1754944e-38, %v275_v61  ;;  %v288_v6 = vand.u32 2147483647, %v261_v57 }
  0x47   : > { %559 = vrcp.f32 %v263_v59  ;;  %v290_v7 = vand.u32 2147483648, %v261_v57  ;;  %vm299_vm4 = vweird.f32 %v262_v58  ;;  %v303_v11 = vand.u32 2147483647, %v262_v58 }
  0x48   : > { %v305_v12 = vand.u32 2147483648, %v262_v58  ;;  %vm314_vm7 = vweird.f32 %v263_v59  ;;  %v320_v18 = vand.u32 2147483648, %v263_v59  ;;  %v318_v21 = vand.u32 2147483647, %v263_v59 }
  0x49   : > { %vm875_vm11 = vcmp.eq.f32.partialorder %v288_v6, 8.507059e+37  ;;  %v291_v25 = vor.u32 1.1754944e-38, %v290_v7  ;;  %vm304_vm13 = vcmp.eq.f32.partialorder %v303_v11, 8.507059e+37 }
  0x4a   : > { %v554_v62 = vpop.eup %553  ;;  %v306_v30 = vor.u32 1.1754944e-38, %v305_v12  ;;  %v321_v33 = vor.u32 1.1754944e-38, %v320_v18  ;;  %vm319_vm15 = vcmp.eq.f32.partialorder %v318_v21, 8.507059e+37 }
  0x4b   : > { %v265_v63 = vmul.f32 %v554_v62, %v260_v53  ;;  %v556_v1 = vpop.eup %555  ;;  %vm270_vm2 = vweird.f32 %v554_v62 }
  0x4c   : > { %v558_v4 = vpop.eup %557  ;;  %v280_v5 = vmul.f32 %v556_v1, %v261_v57  ;;  %vm861_vm5 = vmor %vm269_vm0, %vm270_vm2  ;;  %vm285_vm6 = vweird.f32 %v556_v1 }
  0x4d   : > { %v266_v2 = vsub.f32 1.0, %v265_v63  ;;  %v560_v8 = vpop.eup %559  ;;  %v295_v10 = vmul.f32 %v558_v4, %v262_v58  ;;  %vm300_vm8 = vweird.f32 %v558_v4  ;;  %vm871_vm10 = vmor %vm284_vm3, %vm285_vm6 }
  0x4e   : > { %v281_v14 = vsub.f32 1.0, %v280_v5  ;;  %v310_v15 = vmul.f32 %v560_v8, %v263_v59  ;;  %vm315_vm9 = vweird.f32 %v560_v8  ;;  %vm885_vm12 = vmor %vm299_vm4, %vm300_vm8 }
  0x4f   : > { %v267_v9 = vmul.f32 %v554_v62, %v266_v2  ;;  %v296_v17 = vsub.f32 1.0, %v295_v10  ;;  %vm316_vm14 = vmor %vm314_vm7, %vm315_vm9 }
  0x50   : > { %v282_v19 = vmul.f32 %v556_v1, %v281_v14  ;;  %v311_v20 = vsub.f32 1.0, %v310_v15 }
  0x51   : > { %v268_v16 = vadd.f32 %v554_v62, %v267_v9  ;;  %v297_v26 = vmul.f32 %v558_v4, %v296_v17 }
  0x52   : > { %v283_v28 = vadd.f32 %v556_v1, %v282_v19  ;;  %v312_v31 = vmul.f32 %v560_v8, %v311_v20 }
  0x53   : > { %v272_v22 = vsel %vm861_vm5, %v554_v62, %v268_v16  ;;  %v298_v32 = vadd.f32 %v558_v4, %v297_v26 }
  0x54   : > { %v277_v27 = vsel %vm853_vm1, %v276_v3, %v272_v22  ;;  %v287_v34 = vsel %vm871_vm10, %v556_v1, %v283_v28  ;;  %v313_v35 = vadd.f32 %v560_v8, %v312_v31 }
  0x55   : > { %324 = vst [vmem:[%s195_s7] sm:$0xff] %v277_v27  ;;  %v292_v36 = vsel %vm875_vm11, %v291_v25, %v287_v34  ;;  %v302_v37 = vsel %vm885_vm12, %v558_v4, %v298_v32 }
  0x56   : > { %325 = vst [vmem:[%s195_s7 + $0x8] sm:$0xff] %v292_v36  ;;  %v307_v38 = vsel %vm304_vm13, %v306_v30, %v302_v37  ;;  %v317_v39 = vsel %vm316_vm14, %v560_v8, %v313_v35 }
  0x57   : > { %326 = vst [vmem:[%s195_s7 + $0x10] sm:$0xff] %v307_v38  ;;  %v322_v40 = vsel %vm319_vm15, %v321_v33, %v317_v39 }
  0x58   : > { %327 = vst [vmem:[%s195_s7 + $0x18] sm:$0xff] %v322_v40 }
  0x59   : > { %633 = shalt.err (!%p630_p1)
}
  0x5a   : > { %s697_s17 = smov 128   ;;  %s698_s26 = smov 8  }
  0x5b   : > { %474 = dma.vmem_to_hbm [thread:$0]  (%p766_p8), %s893_s8, 512, %s346_s15, %s329_s16, %s697_s17, %s697_s17, %s698_s26  }
  0x5c PF: > { %s360_s18 = sand.u32 1, %s672_s9   ;;  %p485_p2 = pnand %p449_p13, %p770_p9 }
  0x5d   : > { %s361_s20 = scalar_lea.sflag [#allocation4], %s360_s18 }
  0x5e   : > { %p486_p4 = pneg %p485_p2 }
  0x60   : > { %667 = dma.done.wait (%p486_p4), %s361_s20, 512  }
  0x61   : > { %669 = vsyncadd (%p486_p4), %s361_s20, 4294966784  ;;  %s19_s14 = sadd.s32 1, %s692_s14   ;;  %s954_s9 = smov %s676_s10 }
  0x62   : > { %p16_p6 = scmp.ge.s32.totalorder %s19_s14, 4   ;;  %s955_s10 = smov %s680_s11 }
  0x63   : > { %s956_s11 = smov %s808_s19  ;;  %s957_s12 = smov %s688_s13 }
  0x64   : > { %s958_s13 = smov %s960_s28  ;;  %18 = sbr.rel (!%p16_p6) target bundleno = 7 (0x7), region = 78 }
  0x69   :  { %367 = vsyncpa [#allocation3], 1 }
  0x6a   :  { %369 = vsyncpa [#allocation3 + $0x1], 1 }
  0x6b   :  { %370 = vsyncpa [#allocation4], 1 }
  0x6c   :  { %372 = vsyncpa [#allocation4 + $0x1], 1 }
  0x6d   :  { %373 = vsyncpa [#allocation5], 1 }
  0x6e   :  { %375 = vsyncpa [#allocation5 + $0x1], 1 }

</bundles_post_ra>
